<compile_context>
chip_gen: v5e
topology: v5e:2x2
jax: 0.10.0
libtpu: 0.0.40
codegen_flags: <defaults>
</compile_context>

<pallas_src>
import functools

import jax
import jax.numpy as jnp
from jax import lax
from jax.experimental import pallas as pl
from jax.experimental.pallas import tpu as pltpu

EPS = 1e-5
CP = 8                    # channel pad (= f32 sublane tile height)
NT = 9                    # 3x3 taps
KSTK = NT * CP + CP       # stacked contraction dim: 9 tap blocks + ones (bias) block


# ============================================================================
# Fused forward kernel (single invocation, everything resident in VMEM)
# ============================================================================
def _fused_forward_kernel(x_ref, pup_ref, w0_ref, w1_ref, w2_ref, w3_ref, w4_ref,
                          wfc_ref, bfc_ref, out_ref, taps_ref, xfc_ref,
                          *, B, H, W, C, Cin0, roll_sign):
    """Activation layout: (CP, B*H*W) f32; sublane = channel (zero-padded to CP),
    lane = b*(H*W) + h*W + w.  Each 3x3 conv = 8 lane-rolls + masks written into
    the tap-stack scratch + ONE matmul whose last weight column carries the
    bias / folded-BN shift (multiplying the scratch's constant all-ones block)."""
    f32 = jnp.float32
    S = H * W
    L = B * S

    # --- constant all-ones block (bias column of every stacked weight), once ---
    taps_ref[NT * CP:, :] = jnp.ones((CP, L), f32)

    # --- one-time spatial validity masks, shared by all 5 convs ----------------
    lane = lax.broadcasted_iota(jnp.int32, (1, L), 1)
    sp = lane - (lane // S) * S          # spatial index within each batch chunk
    yy = sp // W
    xx = sp - yy * W
    disps, masks = [], []
    for kh in range(3):
        for kw in range(3):
            dh, dw = kh - 1, kw - 1
            disps.append(dh * W + dw)
            masks.append(((yy + dh >= 0) & (yy + dh < H) &
                          (xx + dw >= 0) & (xx + dw < W)).astype(f32))

    def conv3x3(x, w_ref):
        # x: (CP, L) f32;  w_ref: (CP, KSTK) tap-stacked weight (+ bias column).
        for t in range(NT):
            d = disps[t]
            if d == 0:
                tap = x
            else:
                # tap[l] = x[l + d], zeroed outside the image (mask also kills the
                # lane wrap across the batch boundary of the roll).
                tap = pltpu.roll(x, shift=(roll_sign * d) % L, axis=1) * masks[t]
            taps_ref[t * CP:(t + 1) * CP, :] = tap
        return jnp.dot(w_ref[...], taps_ref[...], preferred_element_type=f32)

    # --- double_layers[0]: ConvTranspose2d(Cin0->C, k3, s2, p1, op1) -----------
    # zero-interleave 2x upsample (scatter matmul) + regular 3x3 conv (flipped w).
    r = jnp.dot(x_ref[...], pup_ref[...], preferred_element_type=f32)   # (B*Cin0, S)
    u = jnp.concatenate([r[b * Cin0:(b + 1) * Cin0, :] for b in range(B)], axis=1)
    x1 = conv3x3(u, w0_ref)

    # --- enhance_layers[0]: ConvTranspose2d(k3, s1, p1) ------------------------
    x2 = conv3x3(x1, w1_ref)

    # --- enhance_layers[1]: BasicBlock (eval-mode BN folded into weight/shift) -
    h1 = jnp.maximum(conv3x3(x2, w2_ref), 0.0)
    x3 = jnp.maximum(conv3x3(h1, w3_ref) + x2, 0.0)

    # --- enhance_layers[2]: ConvTranspose2d(k3, s1, p1) ------------------------
    x4 = conv3x3(x3, w4_ref)

    # --- fc1 over the NCHW flatten: one (B, C*S) @ (C*S, time_dim) matmul ------
    for b in range(B):
        xfc_ref[b:b + 1, :] = jnp.concatenate(
            [x4[c:c + 1, b * S:(b + 1) * S] for c in range(C)], axis=1)
    out_ref[...] = (jnp.dot(xfc_ref[...], wfc_ref[...], preferred_element_type=f32)
                    + bfc_ref[...])


# ============================================================================
# One-time probe: confirm the pltpu.roll rotation convention (not in hot path).
# ============================================================================
def _roll_probe_kernel(x_ref, o_ref):
    o_ref[...] = pltpu.roll(x_ref[...], shift=1, axis=1)


def detect_roll_sign():
    x = jnp.tile(jnp.arange(128, dtype=jnp.float32), (8, 1))
    out = pl.pallas_call(
        _roll_probe_kernel,
        out_shape=jax.ShapeDtypeStruct((8, 128), jnp.float32),
    )(x)
    if bool(jnp.array_equal(out, jnp.roll(x, 1, axis=1))):
        return -1   # roll(x, s)[n] == x[n - s]  ->  use shift = -d to read x[n + d]
    if bool(jnp.array_equal(out, jnp.roll(x, -1, axis=1))):
        return 1
    raise AssertionError("pltpu.roll follows neither rotation convention")


# ============================================================================
# Parameter preparation (ONE time): fold ConvTranspose flip/transpose, BN scale,
# channel padding, bias column and tap-stacking into kernel-ready f32 tensors.
# ============================================================================
def prepare_params(params, *, in_hw, image_size, eps=EPS):
    f32 = jnp.float32
    K = 3

    def ct_to_fwd(w_ct):
        # PyTorch ConvTranspose2d weight (Cin, Cout, K, K) -> equivalent forward
        # cross-correlation weight (Cout, Cin, K, K): spatial flip + channel swap.
        return jnp.flip(w_ct, axis=(2, 3)).transpose(1, 0, 2, 3)

    def stack(w_fwd, shift):
        # (Cout, Cin, K, K) + per-out-channel shift -> (CP, KSTK):
        # column (kh*3+kw)*CP + ci = w[co, ci, kh, kw]; column NT*CP = bias/shift
        # (multiplies the kernel-side constant ones block); padded rows/cols = 0.
        cout, cin = w_fwd.shape[0], w_fwd.shape[1]
        wp = jnp.zeros((CP, CP, K, K), f32).at[:cout, :cin].set(w_fwd.astype(f32))
        w_taps = wp.transpose(0, 2, 3, 1).reshape(CP, NT * CP)
        sh = jnp.zeros((CP,), f32).at[:cout].set(shift.astype(f32))
        return jnp.concatenate(
            [w_taps, sh[:, None], jnp.zeros((CP, CP - 1), f32)], axis=1)

    blk = params['block']
    s1 = blk['bn1_gamma'] / jnp.sqrt(blk['bn1_var'] + eps)
    sh1 = blk['bn1_beta'] - blk['bn1_mean'] * s1
    s2 = blk['bn2_gamma'] / jnp.sqrt(blk['bn2_var'] + eps)
    sh2 = blk['bn2_beta'] - blk['bn2_mean'] * s2

    # 0/1 scatter matrix: per-image zero-interleave 2x upsample (stride-2 dilation),
    # so the stride-2 ConvTranspose becomes (upsample matmul) + plain 3x3 conv.
    si = jnp.arange(in_hw * in_hw)
    ih, iw = si // in_hw, si % in_hw
    pup = jnp.zeros((in_hw * in_hw, image_size * image_size), f32)
    pup = pup.at[si, (2 * ih) * image_size + 2 * iw].set(1.0)

    return {
        'pup': pup,
        'w0': stack(ct_to_fwd(params['double0_w']), params['double0_b']),
        'w1': stack(ct_to_fwd(params['enh0_w']), params['enh0_b']),
        'w2': stack(blk['conv1_w'] * s1[:, None, None, None], sh1),   # BN1 folded
        'w3': stack(blk['conv2_w'] * s2[:, None, None, None], sh2),   # BN2 folded
        'w4': stack(ct_to_fwd(params['enh2_w']), params['enh2_b']),
        'wfc': params['fc1_w'].T.astype(f32),                         # (C*H*W, time_dim)
        'bfc': params['fc1_b'].reshape(1, -1).astype(f32),
    }


# ============================================================================
# Jitted wrapper: only a free NCHW reshape outside + a single pallas_call.
# ============================================================================
def build_forward(prep, *, batch, in_channels, image_size, channel, roll_sign):
    assert in_channels == CP, "encoder input channels must equal the sublane pad (8)"
    H = W = image_size
    L = batch * H * W
    time_dim = prep['bfc'].shape[1]
    kernel = functools.partial(_fused_forward_kernel, B=batch, H=H, W=W,
                               C=channel, Cin0=in_channels, roll_sign=roll_sign)
    vspec = pl.BlockSpec(memory_space=pltpu.MemorySpace.VMEM)

    @jax.jit
    def forward(x_nchw, kp):
        b, cin, h0, w0 = x_nchw.shape
        # Contiguous reshape only (no transpose / dilation / padding glue): rows
        # = b*Cin + c, lanes = ih*w0 + iw.  Everything else happens in-kernel.
        x_rows = x_nchw.reshape(b * cin, h0 * w0).astype(jnp.float32)
        return pl.pallas_call(
            kernel,
            out_shape=jax.ShapeDtypeStruct((batch, time_dim), jnp.float32),
            in_specs=[vspec] * 9,
            out_specs=vspec,
            scratch_shapes=[
                pltpu.VMEM((KSTK, L), jnp.float32),                 # tap-stack RHS
                pltpu.VMEM((batch, channel * H * W), jnp.float32),  # fc1 LHS
            ],
        )(x_rows, kp['pup'], kp['w0'], kp['w1'], kp['w2'], kp['w3'], kp['w4'],
          kp['wfc'], kp['bfc'])

    return forward


# ============================================================================
# Pure-JAX (XLA) reference of the same PyTorch forward, for validation.
# ============================================================================
def _extract_patches_ref(x_nhwc, K, pad_tl, pad_br):
    B, H, W, C = x_nhwc.shape
    xp = jnp.pad(x_nhwc, ((0, 0), (pad_tl, pad_br), (pad_tl, pad_br), (0, 0)))
    OH = H + pad_tl + pad_br - K + 1
    OW = W + pad_tl + pad_br - K + 1
    cols = [xp[:, kh:kh + OH, kw:kw + OW, :] for kh in range(K) for kw in range(K)]
    p = jnp.stack(cols, axis=-1)                        # (B, OH, OW, C, K*K)
    return p.reshape(B * OH * OW, C * K * K), OH, OW


def _conv_transpose_ref(x_nhwc, w_ct, bias, *, stride, padding, output_padding, K=3):
    B, H, W, C = x_nhwc.shape
    if stride > 1:
        Hd, Wd = (H - 1) * stride + 1, (W - 1) * stride + 1
        xd = jnp.zeros((B, Hd, Wd, C), x_nhwc.dtype)
        xd = xd.at[:, ::stride, ::stride, :].set(x_nhwc)
    else:
        xd = x_nhwc
    p, OH, OW = _extract_patches_ref(xd, K, K - 1 - padding,
                                     K - 1 - padding + output_padding)
    w_eff = jnp.flip(w_ct, axis=(2, 3)).transpose(1, 0, 2, 3)     # (Cout, Cin, K, K)
    y = p @ w_eff.reshape(w_eff.shape[0], -1).T + bias
    return y.reshape(B, OH, OW, w_eff.shape[0])


def _conv2d_ref(x_nhwc, w, *, padding, K=3):
    B = x_nhwc.shape[0]
    p, OH, OW = _extract_patches_ref(x_nhwc, K, padding, padding)
    y = p @ w.reshape(w.shape[0], -1).T
    return y.reshape(B, OH, OW, w.shape[0])


def reference_forward(x_nchw, params, eps=EPS):
    x = jnp.transpose(x_nchw, (0, 2, 3, 1))
    x = _conv_transpose_ref(x, params['double0_w'], params['double0_b'],
                            stride=2, padding=1, output_padding=1)
    x = _conv_transpose_ref(x, params['enh0_w'], params['enh0_b'],
                            stride=1, padding=1, output_padding=0)
    blk = params['block']
    s1 = blk['bn1_gamma'] / jnp.sqrt(blk['bn1_var'] + eps)
    sh1 = blk['bn1_beta'] - blk['bn1_mean'] * s1
    s2 = blk['bn2_gamma'] / jnp.sqrt(blk['bn2_var'] + eps)
    sh2 = blk['bn2_beta'] - blk['bn2_mean'] * s2
    r = jnp.maximum(_conv2d_ref(x, blk['conv1_w'], padding=1) * s1 + sh1, 0.0)
    r = _conv2d_ref(r, blk['conv2_w'], padding=1) * s2 + sh2
    x = jnp.maximum(r + x, 0.0)
    x = _conv_transpose_ref(x, params['enh2_w'], params['enh2_b'],
                            stride=1, padding=1, output_padding=0)
    B, H, W, C = x.shape
    xf = jnp.transpose(x, (0, 3, 1, 2)).reshape(B, C * H * W)
    return xf @ params['fc1_w'].T + params['fc1_b']


# ============================================================================
# Main
# ============================================================================
if __name__ == "__main__":
    # Config consistent with the module: target_C=8, target_H=target_W=8,
    # args.image_size=16 -> num_double_layer=1; args.condition_encoder_size=1;
    # args.channel=4; time_dim=32; condition_method='add_t_emb'; stride=1; B=2.
    B = 2
    target_C, target_H, target_W = 8, 8, 8
    image_size = 16
    channel = 4
    time_dim = 32
    cur_C = target_C // 2

    root = jax.random.PRNGKey(0)
    keys = jax.random.split(root, 12)

    def init(k, shape, scale=0.1):
        return (scale * jax.random.normal(k, shape)).astype(jnp.float32)

    ar = jnp.arange(cur_C, dtype=jnp.float32)
    params = {
        # ConvTranspose2d weights have PyTorch shape (Cin, Cout, K, K)
        'double0_w': init(keys[0], (target_C, cur_C, 3, 3)),
        'double0_b': init(keys[1], (cur_C,)),
        'enh0_w': init(keys[2], (cur_C, cur_C, 3, 3)),
        'enh0_b': init(keys[3], (cur_C,)),
        'block': {
            'conv1_w': init(keys[4], (cur_C, cur_C, 3, 3)),   # Conv2d (Cout, Cin, K, K)
            'bn1_gamma': 1.0 + 0.10 * ar, 'bn1_beta': 0.05 * ar,
            'bn1_mean': 0.01 * ar, 'bn1_var': 1.0 + 0.02 * ar,
            'conv2_w': init(keys[5], (cur_C, cur_C, 3, 3)),
            'bn2_gamma': 1.0 - 0.05 * ar, 'bn2_beta': -0.03 * ar,
            'bn2_mean': 0.02 * ar, 'bn2_var': 1.0 + 0.01 * ar,
        },
        'enh2_w': init(keys[6], (cur_C, channel, 3, 3)),
        'enh2_b': init(keys[7], (channel,)),
        'fc1_w': init(keys[8], (time_dim, channel * image_size * image_size), 0.02),
        'fc1_b': init(keys[9], (time_dim,)),
    }
    x = jax.random.normal(keys[10], (B, target_C, target_H, target_W),
                          dtype=jnp.float32)

    roll_sign = detect_roll_sign()                                  # one-time probe
    prep = prepare_params(params, in_hw=target_H, image_size=image_size)
    forward = build_forward(prep, batch=B, in_channels=target_C,
                            image_size=image_size, channel=channel,
                            roll_sign=roll_sign)

    y = jax.block_until_ready(forward(x, prep))
    assert y.shape == (B, time_dim), y.shape
    assert bool(jnp.all(jnp.isfinite(y)))

    # Cross-check against the pure-JAX reference of the same PyTorch math.
    y_ref = reference_forward(x, params)
    max_err = float(jnp.max(jnp.abs(y - y_ref)))
    assert max_err < 3e-2, f"kernel/reference mismatch: max abs err = {max_err}"

    print("KERNEL_OK")
</pallas_src>

<mosaic_0001>
module attributes {stable_mosaic.version = 11 : i64} {
  func.func @_roll_probe_kernel(%arg0: memref<8x128xf32, #tpu.memory_space<vmem>>, %arg1: memref<8x128xf32, #tpu.memory_space<vmem>>) attributes {dimension_semantics = [], scalar_prefetch = 0 : i64, scratch_operands = 0 : i64, tpu.core_type = #tpu.core_type<tc>} {
    %c0 = arith.constant 0 : index
    %c0_0 = arith.constant 0 : index
    %0 = vector.load %arg0[%c0, %c0_0] : memref<8x128xf32, #tpu.memory_space<vmem>>, vector<8x128xf32>
    %c1_i32 = arith.constant 1 : i32
    %1 = tpu.dynamic_rotate %0 by %c1_i32 dim 1 : vector<8x128xf32>, i32 -> vector<8x128xf32>
    %c0_1 = arith.constant 0 : index
    %c0_2 = arith.constant 0 : index
    %2 = vector.load %arg1[%c0_1, %c0_2] : memref<8x128xf32, #tpu.memory_space<vmem>>, vector<8x128xf32>
    tpu.vector_store %arg1[%c0_1, %c0_2], %1 {strides = array<i32>} : memref<8x128xf32, #tpu.memory_space<vmem>>, vector<8x128xf32>,
    return
  }
}

</mosaic_0001>

<bundles_post_ra>
// kernel: tpu_custom_call.1
= control target key start
LH: loop header
LB: loop body
LE: loop exit
PB: predicated region body
PF: predicated region fallthrough
CT: control target
= control target key end

     0   :  { %6 = vsyncpa [#allocation3], 0  ;;  %s118_s0 = inlined_call_operand.hbm [shape: f32[8,128], index: 0, kind: input, shape index: {}]   ;;  %s119_s1 = inlined_call_operand.hbm [shape: f32[8,128], index: 1, kind: output, shape index: {}]  }
   0x1   :  { %7 = vsyncpa [#allocation4], 0  ;;  %s13_s8 = sshll.u32 %s118_s0, 4  ;;  %s99_s9 = smov [#allocation2]   ;;  %s14_s8 = int_to_ptr.hbm [resolvable:$true] %s13_s8 }
   0x2   :  { %s15_s10 = sshll.u32 %s99_s9, 4  ;;  %s16_s10 = int_to_ptr.vmem [resolvable:$true] %s15_s10 }
   0x3   :  { %18 = dma.hbm_to_vmem [thread:$0]  %s14_s8, 128, %s16_s10, [#allocation3]  }
   0x4   :  { %95 = dma.done.wait [#allocation3], 128  }
   0x5   :  { %96 = vsyncadd [#allocation3], 4294967168  ;;  %v23_v0 = vld [vmem:[#allocation2] sm:$0xff]  ;;  %s100_s11 = smov 1   ;;  %s101_s12 = smov [#allocation5]  }
   0x6   :  { %24 = vrot.lane.b32.xlu0 %v23_v0, %s100_s11  ;;  %s32_s13 = sshll.u32 %s101_s12, 4  ;;  %s34_s16 = sshll.u32 %s119_s1, 4  ;;  %s33_s13 = int_to_ptr.vmem [resolvable:$true] %s32_s13  ;;  %s35_s16 = int_to_ptr.hbm [resolvable:$true] %s34_s16 }
  0x78   :  { %v25_v1 = vpop.permute.xlu0 %24 }
  0x79   :  { %26 = vst [vmem:[#allocation5] sm:$0xff] %v25_v1 }
  0x7a   :  { %37 = dma.vmem_to_hbm [thread:$0]  %s33_s13, 128, %s35_s16, [#allocation4]  }
  0x7b   :  { %97 = dma.done.wait [#allocation4], 128  }
  0x7c   :  { %98 = vsyncadd [#allocation4], 4294967168 }
  0x7d   :  { %42 = vsyncpa [#allocation3], 1 }
  0x7e   :  { %43 = vsyncpa [#allocation4], 1 }

</bundles_post_ra>
